<compile_context>
chip_gen: v5e
topology: v5e:2x2
jax: 0.10.0
libtpu: 0.0.40
codegen_flags: <defaults>
</compile_context>

<pallas_src>
import functools

import jax
import jax.numpy as jnp
import numpy as np
from jax import lax
from jax.experimental import pallas as pl
from jax.experimental.pallas import tpu as pltpu


def _rcab_kernel(x_ref, w_ref, p_ref, o_ref, *, Bt, H, WC, C4, KH, dilation, pad):
    """One fat grid step: Bt batch images stacked row-wise as a (Bt*H, WC) slab."""
    BtH = Bt * H
    x2d = x_ref[...].astype(jnp.float32)                      # (Bt*H, WC); also residual

    # Packed parameters (static ref slices -> views, no copies):
    #   rows [0:C4)      W1ᵀ tiled over W, with the 1/(H*W) of the GAP folded in
    #   rows [C4:2C4)    W2 tiled over W
    #   rows [2C4:3C4)   b1/WC broadcast over lanes (lane-sum then adds b1 exactly once)
    #   row  3C4         conv bias, tiled over W
    #   row  3C4+1       attention bias2, tiled over W
    w1t = p_ref[0:C4, :]
    w2t = p_ref[C4:2 * C4, :]
    b1c = p_ref[2 * C4:3 * C4, :]
    bct = p_ref[3 * C4:3 * C4 + 1, :]
    b2t = p_ref[3 * C4 + 1:3 * C4 + 2, :]

    # ---- 3x3 (dilated) conv as KH accumulated MXU dots. ----------------------
    # kw (column) shifts are folded into the banded per-kh weight w_ref[kh];
    # kh (row) shifts are vreg-resident circular rolls + border-row masks
    # (the mask also zeroes rows that would leak across batch images).
    hloc = lax.broadcasted_iota(jnp.int32, (BtH, 1), 0) % H    # row index within image
    conv = jnp.zeros((BtH, WC), jnp.float32)
    for kh in range(KH):
        off = kh * dilation - pad                              # row_in = row_out + off
        if off == 0:
            slab = x2d
        else:
            slab = pltpu.roll(x2d, shift=(-off) % BtH, axis=0)  # slab[r] = x2d[(r+off) % BtH]
            valid = jnp.logical_and(hloc + off >= 0, hloc + off < H)
            slab = jnp.where(valid, slab, 0.0)
        conv = conv + jnp.dot(slab, w_ref[kh], preferred_element_type=jnp.float32)
    conv = jnp.maximum(conv + bct, 0.0)                        # bias + ReLU

    # ---- channel attention per image: GAP -> 1x1 -> LeakyReLU(0.2) -> 1x1 -> σ
    # VPU/XLU/EUP only; the MXU stays free. 1/(H*W) is already folded into w1t.
    conv3 = conv.reshape(Bt, H, WC)
    rowsum = jnp.sum(conv3, axis=1)                                                # (Bt, WC)
    h1 = jnp.sum(rowsum[:, None, :] * w1t[None, :, :] + b1c[None, :, :], axis=2)   # (Bt, C4)
    h1 = jnp.where(h1 > 0, h1, 0.2 * h1)                                           # LeakyReLU
    h2 = jnp.sum(h1[:, :, None] * w2t[None, :, :], axis=1) + b2t                   # (Bt, WC)
    att = 0.5 * (jnp.tanh(0.5 * h2) + 1.0)                     # sigmoid, stable, EUP tanh

    # ---- scale by attention + residual; lane-dense unmasked store. -----------
    out3 = conv3 * att[:, None, :] + x2d.reshape(Bt, H, WC)
    o_ref[...] = out3.reshape(BtH, WC).astype(o_ref.dtype)


def _num_batch_blocks(batch):
    """One fat grid step on single-TC chips (v5e/v6e); two on dual-TC v7x."""
    try:
        kind = jax.devices()[0].device_kind.lower()
    except Exception:
        kind = ""
    if batch >= 2 and batch % 2 == 0 and ("v7" in kind or "7x" in kind):
        return 2
    return 1


def rcab_forward(x_nhwc, wc, bc, w1, b1, w2, b2, *, kernel_size=3, dilation=1):
    B, H, W, C = x_nhwc.shape
    KH, KW = kernel_size, kernel_size
    pad = dilation * (kernel_size - 1) // 2
    C4 = w1.shape[1]
    WC = W * C
    HW = H * W

    # Lane-dense view: fuse (W, C) into the lane axis, stack all batch rows.
    # WC == 128 here (ideal); any multiple of 128 keeps stores unmasked — other
    # sizes remain correct but silently fall back to masked vst/vld.
    x2d = x_nhwc.reshape(B * H, WC)

    # Banded per-kh block weight: folds the KW column shifts so the conv is KH
    # matmuls (Bt*H, WC) @ (WC, WC).
    # TODO(synk): this is quadratic in WC and inflates FLOPs by W/KW — if WC grows
    # past ~512, tile the lane axis (±C halo) or revert to per-tap (H*W, C)@(C, C)
    # matmuls before it collides with v7x's 64 MiB VMEM.
    mats = []
    for kh in range(KH):
        m = jnp.zeros((WC, WC), jnp.float32)
        for kw in range(KW):
            off = kw * dilation - pad                          # w_in = w_out + off
            m = m + jnp.kron(jnp.eye(W, k=-off, dtype=jnp.float32),
                             wc[kh, kw].astype(jnp.float32))
        mats.append(m)
    w3 = jnp.stack(mats, axis=0)                               # (KH, WC, WC)

    # Single packed parameter stream (one constant DMA instead of five).
    w1t = jnp.tile(w1.T.astype(jnp.float32), (1, W)) / float(HW)                   # (C4, WC)
    w2t = jnp.tile(w2.astype(jnp.float32), (1, W))                                 # (C4, WC)
    b1c = jnp.tile((b1.astype(jnp.float32) / float(WC)).reshape(C4, 1), (1, WC))   # (C4, WC)
    bct = jnp.tile(bc.reshape(1, C).astype(jnp.float32), (1, W))                   # (1, WC)
    b2t = jnp.tile(b2.reshape(1, C).astype(jnp.float32), (1, W))                   # (1, WC)
    params = jnp.concatenate([w1t, w2t, b1c, bct, b2t], axis=0)                    # (3*C4+2, WC)

    nblk = _num_batch_blocks(B)
    Bt = B // nblk

    kernel = functools.partial(_rcab_kernel, Bt=Bt, H=H, WC=WC, C4=C4,
                               KH=KH, dilation=dilation, pad=pad)

    out = pl.pallas_call(
        kernel,
        out_shape=jax.ShapeDtypeStruct((B * H, WC), x_nhwc.dtype),
        grid_spec=pltpu.PrefetchScalarGridSpec(
            num_scalar_prefetch=0,
            grid=(nblk,),
            in_specs=[
                pl.BlockSpec((Bt * H, WC), lambda b: (b, 0)),        # x (also residual)
                pl.BlockSpec((KH, WC, WC), lambda b: (0, 0, 0)),     # banded conv weights
                pl.BlockSpec((3 * C4 + 2, WC), lambda b: (0, 0)),    # packed small params
            ],
            out_specs=pl.BlockSpec((Bt * H, WC), lambda b: (b, 0)),
        ),
        # One step on v5e/v6e (single TC); two "parallel" steps on v7x megacore.
        compiler_params=pltpu.CompilerParams(dimension_semantics=("parallel",)),
    )(x2d, w3, params)

    return out.reshape(B, H, W, C)


def rcab_reference(x, wc, bc, w1, b1, w2, b2, *, kernel_size=3, dilation=1):
    """Pure-JAX reference (NHWC), mirrors the PyTorch module."""
    pad = dilation * (kernel_size - 1) // 2
    out = lax.conv_general_dilated(
        x, wc, window_strides=(1, 1), padding=[(pad, pad), (pad, pad)],
        rhs_dilation=(dilation, dilation),
        dimension_numbers=("NHWC", "HWIO", "NHWC")) + bc.reshape(1, 1, 1, -1)
    out = jnp.maximum(out, 0.0)
    pooled = jnp.mean(out, axis=(1, 2))                       # AdaptiveAvgPool2d(1) -> (B, C)
    h1 = pooled @ w1 + b1.reshape(1, -1)
    h1 = jnp.where(h1 > 0, h1, 0.2 * h1)
    att = jax.nn.sigmoid(h1 @ w2 + b2.reshape(1, -1))         # (B, C)
    return out * att[:, None, None, :] + x


def _xavier_uniform(key, shape, fan_in, fan_out, dtype=jnp.float32):
    bound = np.sqrt(6.0 / (fan_in + fan_out))
    return jax.random.uniform(key, shape, dtype, minval=-bound, maxval=bound)


if __name__ == "__main__":
    # Module config: in_channels=8, kernel_size=3, stride=1, dilation=1, bias=True.
    # W*C = 16*8 = 128 -> fully lane-dense fused layout.
    B, C, H, W = 2, 8, 16, 16
    K, DIL = 3, 1
    C4 = C // 4

    key = jax.random.PRNGKey(0)
    kx, kwc, kw1, kw2, kb = jax.random.split(key, 5)

    x = jax.random.normal(kx, (B, H, W, C), jnp.float32)          # NHWC input

    # Conv3x3 weight: (KH, KW, Cin, Cout); xavier-uniform, deterministic.
    wc = _xavier_uniform(kwc, (K, K, C, C), fan_in=C * K * K, fan_out=C * K * K)
    bc = 0.01 * jax.random.normal(kb, (C,), jnp.float32)

    # 1x1 attention convs: (Cin, Cout) matrices.
    w1 = _xavier_uniform(kw1, (C, C4), fan_in=C, fan_out=C4)
    b1 = jnp.zeros((C4,), jnp.float32)
    w2 = _xavier_uniform(kw2, (C4, C), fan_in=C4, fan_out=C)
    b2 = jnp.zeros((C,), jnp.float32)

    y = rcab_forward(x, wc, bc, w1, b1, w2, b2, kernel_size=K, dilation=DIL)
    y = jax.block_until_ready(y)

    y_ref = rcab_reference(x, wc, bc, w1, b1, w2, b2, kernel_size=K, dilation=DIL)
    np.testing.assert_allclose(np.asarray(y), np.asarray(y_ref), rtol=1e-4, atol=1e-5)

    print("KERNEL_OK")
</pallas_src>

<mosaic_0001>
module attributes {stable_mosaic.version = 11 : i64} {
  func.func @_rcab_kernel(%arg0: i32, %arg1: memref<32x128xf32, #tpu.memory_space<vmem>>, %arg2: memref<3x128x128xf32, #tpu.memory_space<vmem>>, %arg3: memref<8x128xf32, #tpu.memory_space<vmem>>, %arg4: memref<32x128xf32, #tpu.memory_space<vmem>>) attributes {dimension_semantics = [#tpu.dimension_semantics<parallel>], iteration_bounds = array<i64: 1>, scalar_prefetch = 0 : i64, scratch_operands = 0 : i64, tpu.core_type = #tpu.core_type<tc>, window_params = [{transform_indices = @transform_0, window_bounds = array<i64: 32, 128>}, {pipeline_mode = #tpu.pipeline_mode<synchronous>, transform_indices = @transform_1, window_bounds = array<i64: 3, 128, 128>}, {pipeline_mode = #tpu.pipeline_mode<synchronous>, transform_indices = @transform_2, window_bounds = array<i64: 8, 128>}, {transform_indices = @transform_3, window_bounds = array<i64: 32, 128>}]} {
    %c0 = arith.constant 0 : index
    %c0_0 = arith.constant 0 : index
    %0 = vector.load %arg1[%c0, %c0_0] : memref<32x128xf32, #tpu.memory_space<vmem>>, vector<32x128xf32>
    %c0_1 = arith.constant 0 : index
    %c0_2 = arith.constant 0 : index
    %1 = vector.load %arg3[%c0_1, %c0_2] : memref<8x128xf32, #tpu.memory_space<vmem>>, vector<2x128xf32>
    %c2 = arith.constant 2 : index
    %c0_3 = arith.constant 0 : index
    %2 = vector.load %arg3[%c2, %c0_3] : memref<8x128xf32, #tpu.memory_space<vmem>>, vector<2x128xf32>
    %c4 = arith.constant 4 : index
    %c0_4 = arith.constant 0 : index
    %3 = vector.load %arg3[%c4, %c0_4] : memref<8x128xf32, #tpu.memory_space<vmem>>, vector<2x128xf32>
    %c6 = arith.constant 6 : index
    %c0_5 = arith.constant 0 : index
    %4 = vector.load %arg3[%c6, %c0_5] : memref<8x128xf32, #tpu.memory_space<vmem>>, vector<1x128xf32>
    %c7 = arith.constant 7 : index
    %c0_6 = arith.constant 0 : index
    %5 = vector.load %arg3[%c7, %c0_6] : memref<8x128xf32, #tpu.memory_space<vmem>>, vector<1x128xf32>
    %6 = tpu.iota {dimensions = array<i32: 0>} : vector<32x1xi32>
    %c16_i32 = arith.constant 16 : i32
    %c0_i32 = arith.constant 0 : i32
    %7 = arith.cmpi eq, %c16_i32, %c0_i32 : i32
    %c1_i32 = arith.constant 1 : i32
    %8 = arith.select %7, %c1_i32, %c16_i32 : i32
    %9 = vector.broadcast %8 : i32 to vector<32x1xi32>
    %10 = arith.remsi %6, %9 : vector<32x1xi32>
    %c0_i32_7 = arith.constant 0 : i32
    %11 = vector.broadcast %c0_i32_7 : i32 to vector<32x1xi32>
    %12 = arith.cmpi ne, %10, %11 : vector<32x1xi32>
    %c0_i32_8 = arith.constant 0 : i32
    %13 = vector.broadcast %c0_i32_8 : i32 to vector<32x1xi32>
    %14 = arith.cmpi slt, %10, %13 : vector<32x1xi32>
    %c0_i32_9 = arith.constant 0 : i32
    %15 = arith.cmpi slt, %8, %c0_i32_9 : i32
    %16 = vector.broadcast %15 : i1 to vector<32x1xi1>
    %17 = vector.broadcast %16 : vector<32x1xi1> to vector<32x1xi1>
    %18 = arith.xori %14, %17 : vector<32x1xi1>
    %19 = arith.andi %18, %12 : vector<32x1xi1>
    %20 = vector.broadcast %8 : i32 to vector<32x1xi32>
    %21 = arith.addi %10, %20 : vector<32x1xi32>
    %22 = arith.select %19, %21, %10 : vector<32x1xi1>, vector<32x1xi32>
    %cst = arith.constant 0.000000e+00 : f32
    %23 = vector.broadcast %cst : f32 to vector<32x128xf32>
    %c1_i32_10 = arith.constant 1 : i32
    %24 = tpu.dynamic_rotate %0 by %c1_i32_10 dim 0 : vector<32x128xf32>, i32 -> vector<32x128xf32>
    %c-1_i32 = arith.constant -1 : i32
    %25 = vector.broadcast %c-1_i32 : i32 to vector<32x1xi32>
    %26 = arith.addi %22, %25 : vector<32x1xi32>
    %c0_i32_11 = arith.constant 0 : i32
    %27 = vector.broadcast %c0_i32_11 : i32 to vector<32x1xi32>
    %28 = arith.cmpi sge, %26, %27 : vector<32x1xi32>
    %c-1_i32_12 = arith.constant -1 : i32
    %29 = vector.broadcast %c-1_i32_12 : i32 to vector<32x1xi32>
    %30 = arith.addi %22, %29 : vector<32x1xi32>
    %c16_i32_13 = arith.constant 16 : i32
    %31 = vector.broadcast %c16_i32_13 : i32 to vector<32x1xi32>
    %32 = arith.cmpi slt, %30, %31 : vector<32x1xi32>
    %33 = arith.andi %28, %32 : vector<32x1xi1>
    %cst_14 = arith.constant 0.000000e+00 : f32
    %34 = vector.shape_cast %33 : vector<32x1xi1> to vector<32x1xi1>
    %35 = vector.broadcast %34 : vector<32x1xi1> to vector<32x128xi1>
    %36 = vector.broadcast %cst_14 : f32 to vector<32x128xf32>
    %37 = arith.select %35, %24, %36 : vector<32x128xi1>, vector<32x128xf32>
    %c0_15 = arith.constant 0 : index
    %c0_16 = arith.constant 0 : index
    %c0_17 = arith.constant 0 : index
    %38 = vector.load %arg2[%c0_15, %c0_16, %c0_17] : memref<3x128x128xf32, #tpu.memory_space<vmem>>, vector<1x128x128xf32>
    %39 = vector.shape_cast %38 : vector<1x128x128xf32> to vector<128x128xf32>
    %cst_18 = arith.constant dense<0.000000e+00> : vector<32x128xf32>
    %40 = tpu.matmul %37, %39, %cst_18 {dimension_numbers = #tpu.dot_dimension_numbers<[1], [0], [0], [1], [0, 0, 1, 1], [], []>} : vector<32x128xf32>, vector<128x128xf32>, vector<32x128xf32> -> vector<32x128xf32>
    %41 = arith.addf %23, %40 : vector<32x128xf32>
    %c1 = arith.constant 1 : index
    %c0_19 = arith.constant 0 : index
    %c0_20 = arith.constant 0 : index
    %42 = vector.load %arg2[%c1, %c0_19, %c0_20] : memref<3x128x128xf32, #tpu.memory_space<vmem>>, vector<1x128x128xf32>
    %43 = vector.shape_cast %42 : vector<1x128x128xf32> to vector<128x128xf32>
    %cst_21 = arith.constant dense<0.000000e+00> : vector<32x128xf32>
    %44 = tpu.matmul %0, %43, %cst_21 {dimension_numbers = #tpu.dot_dimension_numbers<[1], [0], [0], [1], [0, 0, 1, 1], [], []>} : vector<32x128xf32>, vector<128x128xf32>, vector<32x128xf32> -> vector<32x128xf32>
    %45 = arith.addf %41, %44 : vector<32x128xf32>
    %c31_i32 = arith.constant 31 : i32
    %46 = tpu.dynamic_rotate %0 by %c31_i32 dim 0 : vector<32x128xf32>, i32 -> vector<32x128xf32>
    %c1_i32_22 = arith.constant 1 : i32
    %47 = vector.broadcast %c1_i32_22 : i32 to vector<32x1xi32>
    %48 = arith.addi %22, %47 : vector<32x1xi32>
    %c0_i32_23 = arith.constant 0 : i32
    %49 = vector.broadcast %c0_i32_23 : i32 to vector<32x1xi32>
    %50 = arith.cmpi sge, %48, %49 : vector<32x1xi32>
    %c1_i32_24 = arith.constant 1 : i32
    %51 = vector.broadcast %c1_i32_24 : i32 to vector<32x1xi32>
    %52 = arith.addi %22, %51 : vector<32x1xi32>
    %c16_i32_25 = arith.constant 16 : i32
    %53 = vector.broadcast %c16_i32_25 : i32 to vector<32x1xi32>
    %54 = arith.cmpi slt, %52, %53 : vector<32x1xi32>
    %55 = arith.andi %50, %54 : vector<32x1xi1>
    %cst_26 = arith.constant 0.000000e+00 : f32
    %56 = vector.shape_cast %55 : vector<32x1xi1> to vector<32x1xi1>
    %57 = vector.broadcast %56 : vector<32x1xi1> to vector<32x128xi1>
    %58 = vector.broadcast %cst_26 : f32 to vector<32x128xf32>
    %59 = arith.select %57, %46, %58 : vector<32x128xi1>, vector<32x128xf32>
    %c2_27 = arith.constant 2 : index
    %c0_28 = arith.constant 0 : index
    %c0_29 = arith.constant 0 : index
    %60 = vector.load %arg2[%c2_27, %c0_28, %c0_29] : memref<3x128x128xf32, #tpu.memory_space<vmem>>, vector<1x128x128xf32>
    %61 = vector.shape_cast %60 : vector<1x128x128xf32> to vector<128x128xf32>
    %cst_30 = arith.constant dense<0.000000e+00> : vector<32x128xf32>
    %62 = tpu.matmul %59, %61, %cst_30 {dimension_numbers = #tpu.dot_dimension_numbers<[1], [0], [0], [1], [0, 0, 1, 1], [], []>} : vector<32x128xf32>, vector<128x128xf32>, vector<32x128xf32> -> vector<32x128xf32>
    %63 = arith.addf %45, %62 : vector<32x128xf32>
    %64 = vector.broadcast %4 : vector<1x128xf32> to vector<32x128xf32>
    %65 = arith.addf %63, %64 : vector<32x128xf32>
    %cst_31 = arith.constant 0.000000e+00 : f32
    %66 = vector.broadcast %cst_31 : f32 to vector<32x128xf32>
    %67 = arith.maximumf %65, %66 : vector<32x128xf32>
    %68 = vector.shape_cast %67 : vector<32x128xf32> to vector<2x16x128xf32>
    %cst_32 = arith.constant dense<0.000000e+00> : vector<2x128xf32>
    %69 = vector.multi_reduction <add>, %68, %cst_32 [1] : vector<2x16x128xf32> to vector<2x128xf32>
    %70 = vector.shape_cast %69 : vector<2x128xf32> to vector<2x1x128xf32>
    %71 = vector.shape_cast %1 : vector<2x128xf32> to vector<1x2x128xf32>
    %72 = vector.broadcast %70 : vector<2x1x128xf32> to vector<2x2x128xf32>
    %73 = vector.broadcast %71 : vector<1x2x128xf32> to vector<2x2x128xf32>
    %74 = arith.mulf %72, %73 : vector<2x2x128xf32>
    %75 = vector.shape_cast %3 : vector<2x128xf32> to vector<1x2x128xf32>
    %76 = vector.broadcast %75 : vector<1x2x128xf32> to vector<2x2x128xf32>
    %77 = arith.addf %74, %76 : vector<2x2x128xf32>
    %cst_33 = arith.constant dense<0.000000e+00> : vector<2x2xf32>
    %78 = vector.multi_reduction <add>, %77, %cst_33 [2] : vector<2x2x128xf32> to vector<2x2xf32>
    %cst_34 = arith.constant 0.000000e+00 : f32
    %79 = vector.broadcast %cst_34 : f32 to vector<2x2xf32>
    %80 = arith.cmpf ogt, %78, %79 : vector<2x2xf32>
    %cst_35 = arith.constant 2.000000e-01 : f32
    %81 = vector.broadcast %cst_35 : f32 to vector<2x2xf32>
    %82 = arith.mulf %81, %78 : vector<2x2xf32>
    %83 = arith.select %80, %78, %82 : vector<2x2xi1>, vector<2x2xf32>
    %84 = vector.shape_cast %83 : vector<2x2xf32> to vector<2x2x1xf32>
    %85 = vector.shape_cast %2 : vector<2x128xf32> to vector<1x2x128xf32>
    %86 = vector.broadcast %84 : vector<2x2x1xf32> to vector<2x2x128xf32>
    %87 = vector.broadcast %85 : vector<1x2x128xf32> to vector<2x2x128xf32>
    %88 = arith.mulf %86, %87 : vector<2x2x128xf32>
    %cst_36 = arith.constant dense<0.000000e+00> : vector<2x128xf32>
    %89 = vector.multi_reduction <add>, %88, %cst_36 [1] : vector<2x2x128xf32> to vector<2x128xf32>
    %90 = vector.broadcast %5 : vector<1x128xf32> to vector<2x128xf32>
    %91 = arith.addf %89, %90 : vector<2x128xf32>
    %cst_37 = arith.constant 5.000000e-01 : f32
    %92 = vector.broadcast %cst_37 : f32 to vector<2x128xf32>
    %93 = arith.mulf %92, %91 : vector<2x128xf32>
    %94 = math.tanh %93 : vector<2x128xf32>
    %cst_38 = arith.constant 1.000000e+00 : f32
    %95 = vector.broadcast %cst_38 : f32 to vector<2x128xf32>
    %96 = arith.addf %94, %95 : vector<2x128xf32>
    %cst_39 = arith.constant 5.000000e-01 : f32
    %97 = vector.broadcast %cst_39 : f32 to vector<2x128xf32>
    %98 = arith.mulf %97, %96 : vector<2x128xf32>
    %99 = vector.shape_cast %98 : vector<2x128xf32> to vector<2x1x128xf32>
    %100 = vector.broadcast %99 : vector<2x1x128xf32> to vector<2x16x128xf32>
    %101 = arith.mulf %68, %100 : vector<2x16x128xf32>
    %102 = vector.shape_cast %0 : vector<32x128xf32> to vector<2x16x128xf32>
    %103 = arith.addf %101, %102 : vector<2x16x128xf32>
    %104 = vector.shape_cast %103 : vector<2x16x128xf32> to vector<32x128xf32>
    %c0_40 = arith.constant 0 : index
    %c0_41 = arith.constant 0 : index
    %105 = vector.load %arg4[%c0_40, %c0_41] : memref<32x128xf32, #tpu.memory_space<vmem>>, vector<32x128xf32>
    tpu.vector_store %arg4[%c0_40, %c0_41], %104 {strides = array<i32>} : memref<32x128xf32, #tpu.memory_space<vmem>>, vector<32x128xf32>,
    return
  }
  func.func @transform_0(%arg0: i32) -> (i32, i32) {
    %c0_i32 = arith.constant 0 : i32
    %c0_i32_0 = arith.constant 0 : i32
    return %arg0, %c0_i32 : i32, i32
  }
  func.func @transform_1(%arg0: i32) -> (i32, i32, i32) {
    %c0_i32 = arith.constant 0 : i32
    %c0_i32_0 = arith.constant 0 : i32
    %c0_i32_1 = arith.constant 0 : i32
    %c0_i32_2 = arith.constant 0 : i32
    return %c0_i32, %c0_i32_0, %c0_i32_1 : i32, i32, i32
  }
  func.func @transform_2(%arg0: i32) -> (i32, i32) {
    %c0_i32 = arith.constant 0 : i32
    %c0_i32_0 = arith.constant 0 : i32
    %c0_i32_1 = arith.constant 0 : i32
    return %c0_i32, %c0_i32_0 : i32, i32
  }
  func.func @transform_3(%arg0: i32) -> (i32, i32) {
    %c0_i32 = arith.constant 0 : i32
    %c0_i32_0 = arith.constant 0 : i32
    return %arg0, %c0_i32 : i32, i32
  }
}

</mosaic_0001>

<bundles_post_ra>
// kernel: tpu_custom_call.1
= control target key start
LH: loop header
LB: loop body
LE: loop exit
PB: predicated region body
PF: predicated region fallthrough
CT: control target
= control target key end

     0   :  { %8 = vsyncpa [#allocation3], 0  ;;  %s699_s0 = inlined_call_operand.hbm [shape: f32[32,128], index: 0, kind: input, shape index: {}]   ;;  %s700_s1 = inlined_call_operand.hbm [shape: f32[3,128,128], index: 1, kind: input, shape index: {}]   ;;  %s701_s2 = inlined_call_operand.hbm [shape: f32[8,128], index: 2, kind: input, shape index: {}]   ;;  %s702_s3 = inlined_call_operand.hbm [shape: f32[32,128], index: 3, kind: output, shape index: {}]  }
   0x1   :  { %9 = vsyncpa [#allocation6], 0 }
   0x2   :  { %10 = vsyncpa [#allocation4], 0  ;;  %s28_s14 = sshll.u32 %s700_s1, 4  ;;  %s572_s15 = smov [#allocation5]   ;;  %s29_s14 = int_to_ptr.hbm [resolvable:$true] %s28_s14 }
   0x3   :  { %s30_s16 = sshll.u32 %s572_s15, 4  ;;  %s15_s19 = sshll.u32 %s699_s0, 4  ;;  %s31_s16 = int_to_ptr.vmem [resolvable:$true] %s30_s16  ;;  %s16_s19 = int_to_ptr.hbm [resolvable:$true] %s15_s19 }
   0x4   :  { %s573_s20 = smov 128   ;;  %s574_s21 = smov 8  }
   0x5   :  { %36 = dma.hbm_to_vmem [thread:$0]  %s29_s14, 6144, %s31_s16, [#allocation6], %s573_s20, %s573_s20, %s574_s21  }
   0x6   :  { %s575_s22 = smov [#allocation2]   ;;  %s42_s1 = sshll.u32 %s701_s2, 4  ;;  %s43_s1 = int_to_ptr.hbm [resolvable:$true] %s42_s1 }
   0x7   :  { %s17_s23 = sshll.u32 %s575_s22, 4  ;;  %s576_s0 = smov [#allocation7]   ;;  %s18_s23 = int_to_ptr.vmem [resolvable:$true] %s17_s23 }
   0x8   :  { %23 = dma.hbm_to_vmem [thread:$0]  %s16_s19, 512, %s18_s23, [#allocation3], %s573_s20, %s573_s20, %s574_s21  }
   0x9   :  { %s44_s26 = sshll.u32 %s576_s0, 4  ;;  %s45_s26 = int_to_ptr.vmem [resolvable:$true] %s44_s26 }
   0xa   :  { %47 = dma.hbm_to_vmem [thread:$0]  %s43_s1, 128, %s45_s26, [#allocation6]  }
   0xb   :  { %566 = dma.done.wait [#allocation3], 512  }
   0xc   :  { %567 = vsyncadd [#allocation3], 4294966784 }
   0xd   :  { %568 = dma.done.wait [#allocation6], 6272  }
   0xe   :  { %569 = vsyncadd [#allocation6], 4294961024  ;;  %v303_v0 = vld [vmem:[#allocation5 + $0x178] sm:$0xff]  ;;  %v302_v1 = vld [vmem:[#allocation5 + $0x170] sm:$0xff]  ;;  %v69_v26 = vlaneseq  ;;  %vm364_vm6 = vcmask 1041408   ;;  %s577_s2 = smov [#allocation8]  }
   0xf   :  { %v191_v2 = vld [vmem:[#allocation5 + $0xf8] sm:$0xff]  ;;  %304 = vmatpush.msra.mxu2 %v303_v0  ;;  %v190_v4 = vld [vmem:[#allocation5 + $0xf0] sm:$0xff]  ;;  %v301_v5 = vld [vmem:[#allocation5 + $0x168] sm:$0xff]  ;;  %s422_s27 = sshll.u32 %s577_s2, 4  ;;  %s424_s30 = sshll.u32 %s702_s3, 4  ;;  %s423_s27 = int_to_ptr.vmem [resolvable:$true] %s422_s27  ;;  %s425_s30 = int_to_ptr.hbm [resolvable:$true] %s424_s30 }
  0x10   :  { %192 = vmatpush.msra.mxu0 %v191_v2  ;;  %v174_v3 = vld [vmem:[#allocation5 + $0x78] sm:$0xff]  ;;  %442 = vmatpush.msra.mxu3 %v191_v2  ;;  %v173_v6 = vld [vmem:[#allocation5 + $0x70] sm:$0xff]  ;;  %v189_v7 = vld [vmem:[#allocation5 + $0xe8] sm:$0xff]  ;;  %v613_v33 = vshrl.u32 %v69_v26, 7 }
  0x11   :  { %221 = vmatpush.msra.mxu1 %v174_v3  ;;  %305 = vmatpush.msra.mxu2 %v302_v1  ;;  %v172_v8 = vld [vmem:[#allocation5 + $0x68] sm:$0xff]  ;;  %v300_v9 = vld [vmem:[#allocation5 + $0x160] sm:$0xff]  ;;  %v299_v12 = vld [vmem:[#allocation5 + $0x158] sm:$0xff] }
  0x12   :  { %193 = vmatpush.msra.mxu0 %v190_v4  ;;  %443 = vmatpush.msra.mxu3 %v190_v4  ;;  %v188_v10 = vld [vmem:[#allocation5 + $0xe0] sm:$0xff]  ;;  %v187_v13 = vld [vmem:[#allocation5 + $0xd8] sm:$0xff]  ;;  %v298_v15 = vld [vmem:[#allocation5 + $0x150] sm:$0xff]  ;;  %v78_v42 = vand.u32 15, %v613_v33  ;;  %v71_v50 = vadd.s32 8, %v613_v33  ;;  %vm254_vm0 = vcmp.lt.s32.totalorder %v613_v33, 7 }
  0x13   :  { %222 = vmatpush.msra.mxu1 %v173_v6  ;;  %306 = vmatpush.msra.mxu2 %v301_v5  ;;  %v171_v11 = vld [vmem:[#allocation5 + $0x60] sm:$0xff]  ;;  %v170_v14 = vld [vmem:[#allocation5 + $0x58] sm:$0xff]  ;;  %v186_v16 = vld [vmem:[#allocation5 + $0xd0] sm:$0xff]  ;;  %vm126_vm1 = vcmp.lt.s32.totalorder %v613_v33, 1  ;;  %v72_v3 = vadd.s32 16, %v613_v33 }
  0x14   :  { %194 = vmatpush.msra.mxu0 %v189_v7  ;;  %444 = vmatpush.msra.mxu3 %v189_v7  ;;  %v169_v17 = vld [vmem:[#allocation5 + $0x50] sm:$0xff]  ;;  %v297_v18 = vld [vmem:[#allocation5 + $0x148] sm:$0xff]  ;;  %v296_v21 = vld [vmem:[#allocation5 + $0x140] sm:$0xff]  ;;  %v131_v55 = vadd.s32 4294967295, %v78_v42  ;;  %v85_v61 = vand.u32 15, %v71_v50 }
  0x15   :  { %223 = vmatpush.msra.mxu1 %v172_v8  ;;  %307 = vmatpush.msra.mxu2 %v300_v9  ;;  %v185_v19 = vld [vmem:[#allocation5 + $0xc8] sm:$0xff]  ;;  %v184_v22 = vld [vmem:[#allocation5 + $0xc0] sm:$0xff]  ;;  %v295_v24 = vld [vmem:[#allocation5 + $0x138] sm:$0xff]  ;;  %v92_v6 = vand.u32 15, %v72_v3  ;;  %v73_v8 = vadd.s32 24, %v613_v33 }
  0x16   :  { %195 = vmatpush.msra.mxu0 %v188_v10  ;;  %445 = vmatpush.msra.mxu3 %v188_v10  ;;  %v168_v20 = vld [vmem:[#allocation5 + $0x48] sm:$0xff]  ;;  %v167_v23 = vld [vmem:[#allocation5 + $0x40] sm:$0xff]  ;;  %v183_v25 = vld [vmem:[#allocation5 + $0xb8] sm:$0xff]  ;;  %vm135_vm2 = vcmp.ge.s32.totalorder %v131_v55, 0  ;;  %v260_v1 = vadd.s32 1, %v85_v61 }
  0x17   :  { %224 = vmatpush.msra.mxu1 %v171_v11  ;;  %308 = vmatpush.msra.mxu2 %v299_v12  ;;  %v166_v27 = vld [vmem:[#allocation5 + $0x38] sm:$0xff]  ;;  %v294_v28 = vld [vmem:[#allocation5 + $0x130] sm:$0xff]  ;;  %v293_v30 = vld [vmem:[#allocation5 + $0x128] sm:$0xff]  ;;  %v133_v10 = vadd.s32 4294967295, %v92_v6  ;;  %v99_v12 = vand.u32 15, %v73_v8 }
  0x18   :  { %196 = vmatpush.msra.mxu0 %v187_v13  ;;  %446 = vmatpush.msra.mxu3 %v187_v13  ;;  %v182_v29 = vld [vmem:[#allocation5 + $0xb0] sm:$0xff]  ;;  %v181_v32 = vld [vmem:[#allocation5 + $0xa8] sm:$0xff]  ;;  %v292_v35 = vld [vmem:[#allocation5 + $0x120] sm:$0xff]  ;;  %vm268_vm3 = vcmp.lt.s32.totalorder %v260_v1, 16 }
  0x19   :  { %225 = vmatpush.msra.mxu1 %v170_v14  ;;  %309 = vmatpush.msra.mxu2 %v298_v15  ;;  %v165_v31 = vld [vmem:[#allocation5 + $0x30] sm:$0xff]  ;;  %v164_v34 = vld [vmem:[#allocation5 + $0x28] sm:$0xff]  ;;  %v180_v36 = vld [vmem:[#allocation5 + $0xa0] sm:$0xff]  ;;  %vm137_vm4 = vcmp.ge.s32.totalorder %v133_v10, 0  ;;  %v262_v14 = vadd.s32 1, %v99_v12 }
  0x1a   :  { %197 = vmatpush.msra.mxu0 %v186_v16  ;;  %447 = vmatpush.msra.mxu3 %v186_v16  ;;  %v291_v37 = vld [vmem:[#allocation5 + $0x118] sm:$0xff]  ;;  %v163_v38 = vld [vmem:[#allocation5 + $0x20] sm:$0xff]  ;;  %v617_v41 = vld [vmem:[#allocation2 + $0x8] sm:$0xff] }
  0x1b   :  { %226 = vmatpush.msra.mxu1 %v169_v17  ;;  %310 = vmatpush.msra.mxu2 %v297_v18  ;;  %v179_v39 = vld [vmem:[#allocation5 + $0x98] sm:$0xff]  ;;  %v615_v40 = vld [vmem:[#allocation2] sm:$0xff]  ;;  %v290_v45 = vld [vmem:[#allocation5 + $0x110] sm:$0xff]  ;;  %v251_v49 = vrot.slane %v617_v41, 1  ;;  %v123_v2 = vrot.slane %v617_v41, 7  ;;  %vm270_vm5 = vcmp.lt.s32.totalorder %v262_v14, 16 }
  0x1c   :  { %198 = vmatpush.msra.mxu0 %v185_v19  ;;  %448 = vmatpush.msra.mxu3 %v185_v19  ;;  %v162_v43 = vld [vmem:[#allocation5 + $0x18] sm:$0xff]  ;;  %v178_v46 = vld [vmem:[#allocation5 + $0x90] sm:$0xff]  ;;  %v250_v48 = vrot.slane %v615_v40, 1  ;;  %v289_v51 = vld [vmem:[#allocation5 + $0x108] sm:$0xff]  ;;  %v122_v53 = vrot.slane %v615_v40, 7 }
  0x1d   :  { %227 = vmatpush.msra.mxu1 %v168_v20  ;;  %311 = vmatpush.msra.mxu2 %v296_v21  ;;  %v620_v44 = vld [vmem:[#allocation2 + $0x18] sm:$0xff]  ;;  %v161_v47 = vld [vmem:[#allocation5 + $0x10] sm:$0xff]  ;;  %v177_v52 = vld [vmem:[#allocation5 + $0x88] sm:$0xff] }
  0x1e   :  { %199 = vmatpush.msra.mxu0 %v184_v22  ;;  %449 = vmatpush.msra.mxu3 %v184_v22  ;;  %v125_v54 = vrot.slane %v620_v44, 7  ;;  %v160_v56 = vld [vmem:[#allocation5 + $0x8] sm:$0xff]  ;;  %v288_v57 = vld [vmem:[#allocation5 + $0x100] sm:$0xff]  ;;  %v257_v59 = vsel %vm254_vm0, %v250_v48, %v251_v49  ;;  %v633_v63 = vld [vmem:[#allocation2 + $0x10] sm:$0xff]  ;;  %v129_v5 = vsel %vm126_vm1, %v122_v53, %v123_v2  ;;  %v253_v7 = vrot.slane %v620_v44, 1 }
  0x1f   :  { %228 = vmatpush.msra.mxu1 %v167_v23  ;;  %312 = vmatpush.msra.mxu2 %v295_v24  ;;  %v176_v58 = vld [vmem:[#allocation5 + $0x80] sm:$0xff]  ;;  %v252_v0 = vrot.slane %v633_v63, 1  ;;  %v124_v9 = vrot.slane %v633_v63, 7 }
  0x20   :  { %200 = vmatpush.msra.mxu0 %v183_v25  ;;  %450 = vmatpush.msra.mxu3 %v183_v25  ;;  %v159_v60 = vld [vmem:[#allocation5] sm:$0xff]  ;;  %v130_v62 = vsel %vm126_vm1, %v125_v54, %v122_v53  ;;  %v258_v15 = vsel %vm254_vm0, %v253_v7, %v250_v48 }
  0x21   :  { %229 = vmatpush.msra.mxu1 %v166_v27  ;;  %313 = vmatpush.msra.mxu2 %v294_v28  ;;  %v256_v4 = vsel %vm254_vm0, %v251_v49, %v252_v0  ;;  %v255_v11 = vsel %vm254_vm0, %v252_v0, %v253_v7  ;;  %v128_v13 = vsel %vm126_vm1, %v123_v2, %v124_v9  ;;  %v464_v24 = vld [vmem:[#allocation7 + $0x6] ss:$0 sm:$0xff]  ;;  %v66_v55 = vld [vmem:[#allocation7 + $0x4] sm:$0x3]  ;;  %v65_v10 = vld [vmem:[#allocation7 + $0x2] sm:$0x3] }
  0x22   :  { %201 = vmatpush.msra.mxu0 %v182_v29  ;;  %451 = vmatpush.msra.mxu3 %v182_v29  ;;  %v127_v16 = vsel %vm126_vm1, %v124_v9, %v125_v54 }
  0x23   :  { %230 = vmatpush.msra.mxu1 %v165_v31  ;;  %314 = vmatpush.msra.mxu2 %v293_v30 }
  0x24   :  { %202 = vmatpush.msra.mxu0 %v181_v32  ;;  %452 = vmatpush.msra.mxu3 %v181_v32 }
  0x25   :  { %231 = vmatpush.msra.mxu1 %v164_v34  ;;  %315 = vmatpush.msra.mxu2 %v292_v35 }
  0x26   :  { %203 = vmatpush.msra.mxu0 %v180_v36  ;;  %453 = vmatpush.msra.mxu3 %v180_v36 }
  0x27   :  { %232 = vmatpush.msra.mxu1 %v163_v38  ;;  %316 = vmatpush.msra.mxu2 %v291_v37 }
  0x28   :  { %204 = vmatpush.msra.mxu0 %v179_v39  ;;  %454 = vmatpush.msra.mxu3 %v179_v39 }
  0x29   :  { %233 = vmatpush.msra.mxu1 %v162_v43  ;;  %317 = vmatpush.msra.mxu2 %v290_v45 }
  0x2a   :  { %205 = vmatpush.msra.mxu0 %v178_v46  ;;  %455 = vmatpush.msra.mxu3 %v178_v46 }
  0x2b   :  { %234 = vmatpush.msra.mxu1 %v161_v47  ;;  %318 = vmatpush.msra.mxu2 %v289_v51 }
  0x2c   :  { %206 = vmatpush.msra.mxu0 %v177_v52  ;;  %456 = vmatpush.msra.mxu3 %v177_v52  ;;  %v64_v52 = vld [vmem:[#allocation7] sm:$0x3] }
  0x2d   :  { %235 = vmatpush.msra.mxu1 %v160_v56  ;;  %319 = vmatpush.msra.mxu2 %v288_v57 }
  0x2e   :  { %207 = vmatpush.msra.mxu0 %v176_v58  ;;  %320 = vmatmul.f32.vlgmr.msra.gmra.mxu2 %v257_v59 }
  0x2f   :  { %236 = vmatpush.msra.mxu1 %v159_v60  ;;  %208 = vmatmul.f32.vlgmr.msra.gmra.mxu0 %v615_v40 }
  0x30   :  { %438 = vmatmul.msk.f32.vlgmr.msra.gmra.mxu1 %vm135_vm2, %v130_v62  ;;  %457 = vmatpush.msra.mxu3 %v176_v58 }
  0x31   :  { %211 = vmatmul.f32.vlgmr.msra.gmra.mxu3 %v617_v41 }
  0x36   :  { %440 = vmatmul.msk.f32.gmra.mxu2 %vm268_vm3, %v256_v4 }
  0x38   :  { %240 = vmatmul.f32.gmra.mxu1 %v129_v5 }
  0x39   :  { %214 = vmatmul.f32.gmra.mxu3 %v633_v63 }
  0x3e   :  { %326 = vmatmul.f32.gmra.mxu2 %v255_v11 }
  0x40   :  { %439 = vmatmul.msk.f32.gmra.mxu1 %vm137_vm4, %v128_v13 }
  0x41   :  { %217 = vmatmul.f32.gmra.mxu3 %v620_v44 }
  0x46   :  { %441 = vmatmul.msk.f32.gmra.mxu2 %vm270_vm5, %v258_v15 }
  0x48   :  { %246 = vmatmul.f32.gmra.mxu1 %v127_v16 }
  0xac   :  { %v209_v18 = vpop.f32.mrf.mxu0 }
  0xad   :  { %v238_v17 = vpop.f32.mrf.mxu1 }
  0xae   :  { %v239_v20 = vadd.f32 %v238_v17, %v209_v18 }
  0xb1   :  { %v321_v19 = vpop.f32.mrf.mxu2 }
  0xb2   :  { %v333_v23 = vadd.f32 %v321_v19, %v239_v20  ;;  %v465_v19 = vld [vmem:[#allocation7 + $0x7] ss:$0 sm:$0xff] }
  0xb4   :  { %v212_v21 = vpop.f32.mrf.mxu3  ;;  %v657_v27 = vadd.f32 %v464_v24, %v333_v23 }
  0xb5   :  { %v241_v22 = vpop.f32.mrf.mxu1 }
  0xb6   :  { %v242_v25 = vadd.f32 %v241_v22, %v212_v21  ;;  %v342_v32 = vmax.f32 %v657_v27, 0.0 }
  0xb9   :  { %v324_v26 = vpop.f32.mrf.mxu2 }
  0xba   :  { %v334_v28 = vadd.f32 %v324_v26, %v242_v25 }
  0xbc   :  { %v659_v29 = vadd.f32 %v464_v24, %v334_v28  ;;  %v215_v30 = vpop.f32.mrf.mxu3 }
  0xbd   :  { %v244_v31 = vpop.f32.mrf.mxu1 }
  0xbe   :  { %v343_v33 = vmax.f32 %v659_v29, 0.0  ;;  %v245_v37 = vadd.f32 %v244_v31, %v215_v30 }
  0xc0   :  { %v346_v34 = vadd.f32 %v343_v33, %v342_v32 }
  0xc1   :  { %v327_v35 = vpop.f32.mrf.mxu2 }
  0xc2   :  { %v347_v36 = vrot.slane %v346_v34, 4  ;;  %v335_v45 = vadd.f32 %v327_v35, %v245_v37 }
  0xc4   :  { %v348_v38 = vadd.f32 %v347_v36, %v346_v34  ;;  %v218_v39 = vpop.f32.mrf.mxu3  ;;  %v667_v49 = vadd.f32 %v464_v24, %v335_v45 }
  0xc5   :  { %v247_v42 = vpop.f32.mrf.mxu1 }
  0xc6   :  { %v349_v43 = vrot.slane %v348_v38, 2  ;;  %v248_v46 = vadd.f32 %v247_v42, %v218_v39  ;;  %v344_v56 = vmax.f32 %v667_v49, 0.0 }
  0xc8   :  { %v350_v47 = vadd.f32 %v349_v43, %v348_v38 }
  0xc9   :  { %v330_v48 = vpop.f32.mrf.mxu2 }
  0xca   :  { %v336_v50 = vadd.f32 %v330_v48, %v248_v46  ;;  %v351_v51 = vrot.slane %v350_v47, 1 }
  0xcc   :  { %v669_v53 = vadd.f32 %v464_v24, %v336_v50  ;;  %v352_v54 = vadd.f32 %v351_v51, %v350_v47 }
  0xce   :  { %v345_v57 = vmax.f32 %v669_v53, 0.0  ;;  %v360_v58 = vmul.f32 %v352_v54, %v64_v52 }
  0xd0   :  { %v353_v59 = vadd.f32 %v345_v57, %v344_v56  ;;  %v362_v60 = vadd.f32 %v360_v58, %v66_v55 }
  0xd2   :  { %v354_v61 = vrot.slane %v353_v59, 4  ;;  %v365_v62 = vsel %vm364_vm6, %v362_v60, 0.0 }
  0xd3   :  { %366 = vadd.xlane.f32.xlu0 %v365_v62 }
  0xd4   :  { %v355_v0 = vadd.f32 %v354_v61, %v353_v59 }
  0xd6   :  { %v356_v1 = vrot.slane %v355_v0, 2 }
  0xd8   :  { %v357_v2 = vadd.f32 %v356_v1, %v355_v0 }
  0xda   :  { %v358_v3 = vrot.slane %v357_v2, 1 }
  0xdc   :  { %v359_v4 = vadd.f32 %v358_v3, %v357_v2 }
  0xde   :  { %v361_v5 = vmul.f32 %v359_v4, %v64_v52 }
  0xe0   :  { %v363_v6 = vadd.f32 %v361_v5, %v66_v55 }
  0xe2   :  { %v368_v7 = vsel %vm364_vm6, %v363_v6, 0.0 }
  0xe3   :  { %369 = vadd.xlane.f32.xlu0 %v368_v7 }
 0x146   :  { %v367_v8 = vpop.xlane.xlu0 %366 }
 0x147   :  { %vm371_vm7 = vcmp.gt.f32.partialorder %v367_v8, 0.0  ;;  %v373_v9 = vmul.f32 0.2, %v367_v8 }
 0x149   :  { %v375_v11 = vsel %vm371_vm7, %v367_v8, %v373_v9 }
 0x14a   :  { %v377_v12 = vmul.f32 %v375_v11, %v65_v10 }
 0x14c   :  { %v379_v13 = vsel %vm364_vm6, %v377_v12, 0.0 }
 0x14d   :  { %v380_v14 = vrot.slane %v379_v13, 4 }
 0x14f   :  { %v381_v15 = vadd.f32 %v380_v14, %v379_v13 }
 0x151   :  { %v382_v16 = vrot.slane %v381_v15, 2 }
 0x153   :  { %v383_v17 = vadd.f32 %v382_v16, %v381_v15 }
 0x155   :  { %v384_v18 = vrot.slane %v383_v17, 1 }
 0x156   :  { %v370_v20 = vpop.xlane.xlu0 %369 }
 0x157   :  { %v385_v21 = vadd.f32 %v384_v18, %v383_v17  ;;  %vm372_vm8 = vcmp.gt.f32.partialorder %v370_v20, 0.0  ;;  %v374_v22 = vmul.f32 0.2, %v370_v20 }
 0x159   :  { %v394_v23 = vadd.f32 %v465_v19, %v385_v21  ;;  %v376_v24 = vsel %vm372_vm8, %v370_v20, %v374_v22 }
 0x15a   :  { %v378_v25 = vmul.f32 %v376_v24, %v65_v10 }
 0x15b   :  { %v396_v26 = vmul.f32 0.5, %v394_v23 }
 0x15c   :  { %v386_v28 = vsel %vm364_vm6, %v378_v25, 0.0 }
 0x15d   :  { %466 = vtanh.f32 %v396_v26  ;;  %v387_v30 = vrot.slane %v386_v28, 4 }
 0x15f   :  { %v388_v31 = vadd.f32 %v387_v30, %v386_v28 }
 0x161   :  { %v389_v34 = vrot.slane %v388_v31, 2 }
 0x163   :  { %v467_v35 = vpop.eup %466  ;;  %v390_v36 = vadd.f32 %v389_v34, %v388_v31 }
 0x164   :  { %v400_v37 = vadd.f32 1.0, %v467_v35 }
 0x165   :  { %v391_v38 = vrot.slane %v390_v36, 1 }
 0x166   :  { %v402_v39 = vmul.f32 0.5, %v400_v37 }
 0x167   :  { %v392_v42 = vadd.f32 %v391_v38, %v390_v36 }
 0x168   :  { %v404_v43 = vperm.slane %v402_v39, 0 }
 0x169   :  { %v395_v45 = vadd.f32 %v465_v19, %v392_v42 }
 0x16a   :  { %v406_v46 = vmul.f32 %v404_v43, %v342_v32  ;;  %v407_v47 = vmul.f32 %v404_v43, %v343_v33 }
 0x16b   :  { %v397_v48 = vmul.f32 0.5, %v395_v45 }
 0x16c   :  { %v410_v50 = vadd.f32 %v406_v46, %v615_v40  ;;  %v411_v51 = vadd.f32 %v407_v47, %v617_v41 }
 0x16d   :  { %468 = vtanh.f32 %v397_v48 }
 0x16e   :  { %414 = vst [vmem:[#allocation8] sm:$0xff] %v410_v50 }
 0x16f   :  { %415 = vst [vmem:[#allocation8 + $0x8] sm:$0xff] %v411_v51 }
 0x173   :  { %v469_v52 = vpop.eup %468 }
 0x174   :  { %v401_v54 = vadd.f32 1.0, %v469_v52 }
 0x176   :  { %v403_v55 = vmul.f32 0.5, %v401_v54 }
 0x178   :  { %v405_v58 = vperm.slane %v403_v55, 0 }
 0x17a   :  { %v408_v59 = vmul.f32 %v405_v58, %v344_v56  ;;  %v409_v27 = vmul.f32 %v405_v58, %v345_v57 }
 0x17c   :  { %v412_v40 = vadd.f32 %v408_v59, %v633_v63  ;;  %v413_v41 = vadd.f32 %v409_v27, %v620_v44 }
 0x17e   :  { %416 = vst [vmem:[#allocation8 + $0x10] sm:$0xff] %v412_v40 }
 0x17f   :  { %417 = vst [vmem:[#allocation8 + $0x18] sm:$0xff] %v413_v41 }
 0x180   :  { %430 = dma.vmem_to_hbm [thread:$0]  %s423_s27, 512, %s425_s30, [#allocation4], %s573_s20, %s573_s20, %s574_s21  }
 0x181   :  { %570 = dma.done.wait [#allocation4], 512  }
 0x182   :  { %571 = vsyncadd [#allocation4], 4294966784 }
 0x183   :  { %435 = vsyncpa [#allocation3], 1 }
 0x184   :  { %436 = vsyncpa [#allocation6], 1 }
 0x185   :  { %437 = vsyncpa [#allocation4], 1 }

</bundles_post_ra>
